<compile_context>
chip_gen: v6e
topology: v6e:2x2x1
jax: 0.10.0
libtpu: 0.0.40
codegen_flags: <defaults>
</compile_context>

<pallas_src>
import jax
import jax.numpy as jnp
from jax.experimental import pallas as pl
from jax.experimental.pallas import tpu as pltpu

IN_F = 100
HID = 20
OUT_F = 6

MAX_TB = 2048  # ~800 KB per f32 x tile; ~1.6 MB double-buffered -> fits every gen's VMEM budget


def ff_kernel(x_ref, w1_ref, b1_ref, w2_ref, b2_ref, out_ref, lin_ref):
    # TODO(synk): nn.Dropout(p=0.4) is identity in eval mode; training-mode mask
    # (pltpu.prng_random_bits + scale) intentionally omitted.
    x = x_ref[...].astype(jnp.float32)                               # [TB, 100]
    lin = jnp.dot(x, w1_ref[...].astype(jnp.float32),
                  preferred_element_type=jnp.float32) + b1_ref[...]  # [TB, 20]
    lin_ref[...] = lin.astype(lin_ref.dtype)
    h = jnp.maximum(lin, 0.0)                                        # ReLU
    out = jnp.dot(h, w2_ref[...].astype(jnp.float32),
                  preferred_element_type=jnp.float32) + b2_ref[...]  # [TB, 6]
    out_ref[...] = out.astype(out_ref.dtype)


def _pick_tb(B):
    # Single block if the whole batch is small; otherwise a big multiple-of-8 tile.
    if B <= MAX_TB:
        return B
    return MAX_TB


def feedforward4(x, w1, b1, w2, b2):
    B = x.shape[0]
    TB = _pick_tb(B)
    grid = (pl.cdiv(B, TB),)

    # Batch-tiled x / outputs; weights and biases resident via constant index maps.
    x_spec = pl.BlockSpec((TB, IN_F), lambda i: (i, 0))
    w1_spec = pl.BlockSpec((IN_F, HID), lambda i: (0, 0))
    b1_spec = pl.BlockSpec((1, HID), lambda i: (0, 0))
    w2_spec = pl.BlockSpec((HID, OUT_F), lambda i: (0, 0))
    b2_spec = pl.BlockSpec((1, OUT_F), lambda i: (0, 0))
    out_spec = pl.BlockSpec((TB, OUT_F), lambda i: (i, 0))
    lin_spec = pl.BlockSpec((TB, HID), lambda i: (i, 0))

    cost = pl.CostEstimate(
        flops=2 * B * (IN_F * HID + HID * OUT_F),
        bytes_accessed=4 * (B * (IN_F + HID + OUT_F)
                            + IN_F * HID + HID + HID * OUT_F + OUT_F),
        transcendentals=0,
    )

    out, lin_out = pl.pallas_call(
        ff_kernel,
        grid=grid,
        in_specs=[x_spec, w1_spec, b1_spec, w2_spec, b2_spec],
        out_specs=(out_spec, lin_spec),
        out_shape=(
            jax.ShapeDtypeStruct((B, OUT_F), jnp.float32),   # final output
            jax.ShapeDtypeStruct((B, HID), jnp.float32),     # lin_out (pre-ReLU)
        ),
        compiler_params=pltpu.CompilerParams(
            dimension_semantics=("parallel",),
        ),
        cost_estimate=cost,
    )(x, w1, b1, w2, b2)
    return out, lin_out


def init_params(key):
    # Deterministic init mimicking nn.Linear's uniform(-1/sqrt(fan_in), 1/sqrt(fan_in)).
    k1, k2, k3, k4 = jax.random.split(key, 4)
    bound1 = 1.0 / jnp.sqrt(IN_F)
    bound2 = 1.0 / jnp.sqrt(HID)
    w1 = jax.random.uniform(k1, (IN_F, HID), jnp.float32, -bound1, bound1)
    b1 = jax.random.uniform(k2, (1, HID), jnp.float32, -bound1, bound1)
    w2 = jax.random.uniform(k3, (HID, OUT_F), jnp.float32, -bound2, bound2)
    b2 = jax.random.uniform(k4, (1, OUT_F), jnp.float32, -bound2, bound2)
    return w1, b1, w2, b2


if __name__ == "__main__":
    key = jax.random.PRNGKey(0)
    kx, kp = jax.random.split(key)
    B = 8
    x = jax.random.normal(kx, (B, IN_F), jnp.float32)
    w1, b1, w2, b2 = init_params(kp)

    out, lin_out = feedforward4(x, w1, b1, w2, b2)
    jax.block_until_ready((out, lin_out))

    # Reference check in plain JAX (same semantics, eval-mode dropout).
    lin_ref = x @ w1 + b1
    out_ref = jnp.maximum(lin_ref, 0.0) @ w2 + b2
    assert jnp.allclose(lin_out, lin_ref, atol=1e-5), "lin_out mismatch"
    assert jnp.allclose(out, out_ref, atol=1e-5), "out mismatch"

    print("KERNEL_OK")
</pallas_src>

<mosaic_0001>
module attributes {stable_mosaic.version = 11 : i64} {
  func.func @ff_kernel(%arg0: i32, %arg1: memref<8x100xf32, #tpu.memory_space<vmem>>, %arg2: memref<100x20xf32, #tpu.memory_space<vmem>>, %arg3: memref<1x20xf32, #tpu.memory_space<vmem>>, %arg4: memref<20x6xf32, #tpu.memory_space<vmem>>, %arg5: memref<1x6xf32, #tpu.memory_space<vmem>>, %arg6: memref<8x6xf32, #tpu.memory_space<vmem>>, %arg7: memref<8x20xf32, #tpu.memory_space<vmem>>) attributes {dimension_semantics = [#tpu.dimension_semantics<parallel>], iteration_bounds = array<i64: 1>, scalar_prefetch = 0 : i64, scratch_operands = 0 : i64, tpu.core_type = #tpu.core_type<tc>, window_params = [{transform_indices = @transform_0, window_bounds = array<i64: 8, 100>}, {pipeline_mode = #tpu.pipeline_mode<synchronous>, transform_indices = @transform_1, window_bounds = array<i64: 100, 20>}, {pipeline_mode = #tpu.pipeline_mode<synchronous>, transform_indices = @transform_2, window_bounds = array<i64: 1, 20>}, {pipeline_mode = #tpu.pipeline_mode<synchronous>, transform_indices = @transform_3, window_bounds = array<i64: 20, 6>}, {pipeline_mode = #tpu.pipeline_mode<synchronous>, transform_indices = @transform_4, window_bounds = array<i64: 1, 6>}, {transform_indices = @transform_5, window_bounds = array<i64: 8, 6>}, {transform_indices = @transform_6, window_bounds = array<i64: 8, 20>}]} {
    %c0 = arith.constant 0 : index
    %c0_0 = arith.constant 0 : index
    %0 = vector.load %arg1[%c0, %c0_0] : memref<8x100xf32, #tpu.memory_space<vmem>>, vector<8x100xf32>
    %c0_1 = arith.constant 0 : index
    %c0_2 = arith.constant 0 : index
    %1 = vector.load %arg2[%c0_1, %c0_2] : memref<100x20xf32, #tpu.memory_space<vmem>>, vector<100x20xf32>
    %cst = arith.constant dense<0.000000e+00> : vector<8x20xf32>
    %2 = tpu.matmul %0, %1, %cst {dimension_numbers = #tpu.dot_dimension_numbers<[1], [0], [0], [1], [0, 0, 1, 1], [], []>} : vector<8x100xf32>, vector<100x20xf32>, vector<8x20xf32> -> vector<8x20xf32>
    %c0_3 = arith.constant 0 : index
    %c0_4 = arith.constant 0 : index
    %3 = vector.load %arg3[%c0_3, %c0_4] : memref<1x20xf32, #tpu.memory_space<vmem>>, vector<1x20xf32>
    %4 = vector.broadcast %3 : vector<1x20xf32> to vector<8x20xf32>
    %5 = arith.addf %2, %4 : vector<8x20xf32>
    %c0_5 = arith.constant 0 : index
    %c0_6 = arith.constant 0 : index
    %6 = vector.load %arg7[%c0_5, %c0_6] : memref<8x20xf32, #tpu.memory_space<vmem>>, vector<8x20xf32>
    tpu.vector_store %arg7[%c0_5, %c0_6], %5 {strides = array<i32>} : memref<8x20xf32, #tpu.memory_space<vmem>>, vector<8x20xf32>,
    %cst_7 = arith.constant 0.000000e+00 : f32
    %7 = vector.broadcast %cst_7 : f32 to vector<8x20xf32>
    %8 = arith.maximumf %5, %7 : vector<8x20xf32>
    %c0_8 = arith.constant 0 : index
    %c0_9 = arith.constant 0 : index
    %9 = vector.load %arg4[%c0_8, %c0_9] : memref<20x6xf32, #tpu.memory_space<vmem>>, vector<20x6xf32>
    %cst_10 = arith.constant dense<0.000000e+00> : vector<8x6xf32>
    %10 = tpu.matmul %8, %9, %cst_10 {dimension_numbers = #tpu.dot_dimension_numbers<[1], [0], [0], [1], [0, 0, 1, 1], [], []>} : vector<8x20xf32>, vector<20x6xf32>, vector<8x6xf32> -> vector<8x6xf32>
    %c0_11 = arith.constant 0 : index
    %c0_12 = arith.constant 0 : index
    %11 = vector.load %arg5[%c0_11, %c0_12] : memref<1x6xf32, #tpu.memory_space<vmem>>, vector<1x6xf32>
    %12 = vector.broadcast %11 : vector<1x6xf32> to vector<8x6xf32>
    %13 = arith.addf %10, %12 : vector<8x6xf32>
    %c0_13 = arith.constant 0 : index
    %c0_14 = arith.constant 0 : index
    %14 = vector.load %arg6[%c0_13, %c0_14] : memref<8x6xf32, #tpu.memory_space<vmem>>, vector<8x6xf32>
    tpu.vector_store %arg6[%c0_13, %c0_14], %13 {strides = array<i32>} : memref<8x6xf32, #tpu.memory_space<vmem>>, vector<8x6xf32>,
    return
  }
  func.func @transform_0(%arg0: i32) -> (i32, i32) {
    %c0_i32 = arith.constant 0 : i32
    %c0_i32_0 = arith.constant 0 : i32
    return %arg0, %c0_i32 : i32, i32
  }
  func.func @transform_1(%arg0: i32) -> (i32, i32) {
    %c0_i32 = arith.constant 0 : i32
    %c0_i32_0 = arith.constant 0 : i32
    %c0_i32_1 = arith.constant 0 : i32
    return %c0_i32, %c0_i32_0 : i32, i32
  }
  func.func @transform_2(%arg0: i32) -> (i32, i32) {
    %c0_i32 = arith.constant 0 : i32
    %c0_i32_0 = arith.constant 0 : i32
    %c0_i32_1 = arith.constant 0 : i32
    return %c0_i32, %c0_i32_0 : i32, i32
  }
  func.func @transform_3(%arg0: i32) -> (i32, i32) {
    %c0_i32 = arith.constant 0 : i32
    %c0_i32_0 = arith.constant 0 : i32
    %c0_i32_1 = arith.constant 0 : i32
    return %c0_i32, %c0_i32_0 : i32, i32
  }
  func.func @transform_4(%arg0: i32) -> (i32, i32) {
    %c0_i32 = arith.constant 0 : i32
    %c0_i32_0 = arith.constant 0 : i32
    %c0_i32_1 = arith.constant 0 : i32
    return %c0_i32, %c0_i32_0 : i32, i32
  }
  func.func @transform_5(%arg0: i32) -> (i32, i32) {
    %c0_i32 = arith.constant 0 : i32
    %c0_i32_0 = arith.constant 0 : i32
    return %arg0, %c0_i32 : i32, i32
  }
  func.func @transform_6(%arg0: i32) -> (i32, i32) {
    %c0_i32 = arith.constant 0 : i32
    %c0_i32_0 = arith.constant 0 : i32
    return %arg0, %c0_i32 : i32, i32
  }
}

</mosaic_0001>

<bundles_post_ra>
// kernel: tpu_custom_call.1
= control target key start
LH: loop header
LB: loop body
LE: loop exit
PB: predicated region body
PF: predicated region fallthrough
CT: control target
= control target key end

     0   :  { %12 = vsyncpa [#allocation3], 0  ;;  %vm49_vm0 = vcmask 1043456   ;;  %v352_v1 = vmov 0.0   ;;  %vm353_vm1 = vmmov 0   ;;  %s456_s0 = inlined_call_operand.vmem [shape: f32[8,100], index: 0, kind: input, shape index: {}]   ;;  %s457_s1 = inlined_call_operand.vmem [shape: f32[100,20], index: 1, kind: input, shape index: {}]   ;;  %s458_s2 = inlined_call_operand.vmem [shape: f32[1,20], index: 2, kind: input, shape index: {}]   ;;  %s459_s3 = inlined_call_operand.vmem [shape: f32[20,6], index: 3, kind: input, shape index: {}]   ;;  %s460_s4 = inlined_call_operand.vmem [shape: f32[1,6], index: 4, kind: input, shape index: {}]   ;;  %s461_s5 = inlined_call_operand.hbm [shape: f32[8,6], index: 5, kind: output, shape index: {0}]   ;;  %s462_s6 = inlined_call_operand.hbm [shape: f32[8,20], index: 6, kind: output, shape index: {1}]  }
   0x1   :  { %v37_v0 = vld [vmem:[%s457_s1 + $0x60] sm:$0xf]  ;;  %266 = vmatprep.subr.mxu0 %v352_v1  ;;  %v36_v2 = vld [vmem:[%s457_s1 + $0x58] sm:$0xff]  ;;  %295 = vmatprep.subr.mxu1 %v352_v1  ;;  %v35_v3 = vld [vmem:[%s457_s1 + $0x50] sm:$0xff] }
   0x2   :  { %267 = vmatpush3.msk.msra.mxu0 %vm49_vm0, %v37_v0  ;;  %292 = vmatprep.mubr.msk.f32.mxu0 %vm353_vm1, %v352_v1  ;;  %v34_v4 = vld [vmem:[%s457_s1 + $0x48] sm:$0xff] }
   0x3   :  { %268 = vmatprep.subr.mxu0 %v352_v1  ;;  %301 = vmatprep.mubr.msk.f32.mxu1 %vm353_vm1, %v352_v1 }
   0x4   :  { %269 = vmatpush3.msra.mxu0 %v36_v2 }
   0x5   :  { %270 = vmatprep.subr.mxu0 %v352_v1 }
   0x6   :  { %13 = vsyncpa [#allocation5], 0  ;;  %271 = vmatpush3.msra.mxu0 %v35_v3  ;;  %v33_v5 = vld [vmem:[%s457_s1 + $0x40] sm:$0xff]  ;;  %v32_v6 = vld [vmem:[%s457_s1 + $0x38] sm:$0xff]  ;;  %vm45_vm2 = vcmask 818176   ;;  %vm123_vm3 = vcmask 162816  }
   0x7   :  { %272 = vmatprep.subr.mxu0 %v352_v1  ;;  %v31_v7 = vld [vmem:[%s457_s1 + $0x30] sm:$0xff]  ;;  %v30_v8 = vld [vmem:[%s457_s1 + $0x28] sm:$0xff]  ;;  %v29_v9 = vld [vmem:[%s457_s1 + $0x20] sm:$0xff]  ;;  %s354_s7 = smov [#allocation4]  }
   0x8   :  { %273 = vmatpush3.msra.mxu0 %v34_v4  ;;  %v28_v10 = vld [vmem:[%s457_s1 + $0x18] sm:$0xff]  ;;  %v27_v11 = vld [vmem:[%s457_s1 + $0x10] sm:$0xff]  ;;  %v26_v12 = vld [vmem:[%s457_s1 + $0x8] sm:$0xff]  ;;  %s230_s8 = sshll.u32 %s354_s7, 4  ;;  %s231_s8 = int_to_ptr.vmem [resolvable:$true] %s230_s8 }
   0x9   :  { %274 = vmatprep.subr.mxu0 %v352_v1  ;;  %v25_v13 = vld [vmem:[%s457_s1] sm:$0xff]  ;;  %v128_v15 = vld [vmem:[%s459_s3 + $0x10] sm:$0xf]  ;;  %v127_v16 = vld [vmem:[%s459_s3 + $0x8] sm:$0xff]  ;;  %s308_s9 = scalar_lea.vmem %s231_s8, 128  ;;  %p313_p1 = scmp.lt.s32.totalorder %s231_s8, %s231_s8 }
   0xa   :  { %275 = vmatpush3.msra.mxu0 %v33_v5  ;;  %v24_v14 = vld [vmem:[%s456_s0] sm:$0xff]  ;;  %296 = vmatpush3.msk.msra.mxu1 %vm49_vm0, %v128_v15  ;;  %p309_p0 = scmp.ne.s32.totalorder %s231_s8, %s308_s9  ;;  %p314_p2 = scmp.lt.s32.totalorder %s308_s9, %s308_s9 }
   0xb   :  { %276 = vmatprep.subr.mxu0 %v352_v1  ;;  %297 = vmatprep.subr.mxu1 %v352_v1  ;;  %v126_v17 = vld [vmem:[%s459_s3] sm:$0xff] }
   0xc   :  { %277 = vmatpush3.msra.mxu0 %v32_v6  ;;  %298 = vmatpush3.msra.mxu1 %v127_v16  ;;  %v242_v18 = vld [vmem:[%s458_s2] ss:$0 sm:$0xff]  ;;  %p315_p3 = por %p314_p2, %p313_p1 }
   0xd   :  { %278 = vmatprep.subr.mxu0 %v352_v1  ;;  %299 = vmatprep.subr.mxu1 %v352_v1 }
   0xe   :  { %279 = vmatpush3.msra.mxu0 %v31_v7  ;;  %300 = vmatpush3.msra.mxu1 %v126_v17  ;;  %p316_p4 = pnand %p315_p3, %p309_p0 }
   0xf   :  { %280 = vmatprep.subr.mxu0 %v352_v1 }
  0x10   :  { %281 = vmatpush3.msra.mxu0 %v30_v8 }
  0x11   :  { %282 = vmatprep.subr.mxu0 %v352_v1 }
  0x12   :  { %283 = vmatpush3.msra.mxu0 %v29_v9 }
  0x13   :  { %284 = vmatprep.subr.mxu0 %v352_v1 }
  0x14   :  { %285 = vmatpush3.msra.mxu0 %v28_v10 }
  0x15   :  { %286 = vmatprep.subr.mxu0 %v352_v1 }
  0x16   :  { %287 = vmatpush3.msra.mxu0 %v27_v11 }
  0x17   :  { %288 = vmatprep.subr.mxu0 %v352_v1 }
  0x18   :  { %289 = vmatpush3.msra.mxu0 %v26_v12 }
  0x19   :  { %290 = vmatprep.subr.mxu0 %v352_v1 }
  0x1a   :  { %291 = vmatpush3.msra.mxu0 %v25_v13 }
  0x1b   :  { %293 = vmatmul.mubr.msk.f32.vlgmr.msra.gmra.mxu0 %vm45_vm2, %v24_v14 }
  0xdb   :  { %v119_v19 = vpop.f32.mrf.mxu0 }
  0xdc   :  { %v120_v20 = vadd.f32 %v242_v18, %v119_v19 }
  0xdd   :  { %v294_v21 = vpop.f32.mrf.mxu0 }
  0xde   :  { %v125_v22 = vmax.f32 %v120_v20, 0.0  ;;  %124 = vst.msk [vmem:[#allocation4] sm:$0xff] %vm123_vm3, %v120_v20 }
  0xe0   :  { %302 = vmatmul.mubr.msk.f32.vlgmr.msra.gmra.mxu1 %vm123_vm3, %v125_v22 }
  0xe1   :  { %319 = shalt.err (!%p316_p4)
}
  0xe2   :  { %233 = dma.vmem_to_hbm [thread:$0]  %s231_s8, 128, %s462_s6, [#allocation5]   ;;  %v245_v23 = vld [vmem:[%s460_s4] ss:$0 sm:$0xff]  ;;  %vm212_vm4 = vcmask 48128  }
  0xe3   :  { %s355_s12 = smov [#allocation2]  }
  0xe4   :  { %s220_s13 = sshll.u32 %s355_s12, 4  ;;  %s221_s13 = int_to_ptr.vmem [resolvable:$true] %s220_s13 }
  0xe5   :  { %s328_s14 = scalar_lea.vmem %s221_s13, 128  ;;  %p333_p6 = scmp.lt.s32.totalorder %s221_s13, %s221_s13 }
  0xe6   :  { %p329_p5 = scmp.ne.s32.totalorder %s221_s13, %s328_s14  ;;  %p334_p7 = scmp.lt.s32.totalorder %s328_s14, %s328_s14 }
  0xe8   :  { %p335_p8 = por %p334_p7, %p333_p6 }
  0xea   :  { %p336_p9 = pnand %p335_p8, %p329_p5 }
 0x1a0   :  { %v208_v24 = vpop.f32.mrf.mxu1 }
 0x1a1   :  { %v209_v25 = vadd.f32 %v245_v23, %v208_v24 }
 0x1a2   :  { %v303_v26 = vpop.f32.mrf.mxu1 }
 0x1a3   :  { %213 = vst.msk [vmem:[#allocation2] sm:$0xff] %vm212_vm4, %v209_v25 }
 0x1a4   :  { %339 = shalt.err (!%p336_p9)
}
 0x1a5   :  { %223 = dma.vmem_to_hbm [thread:$0]  %s221_s13, 128, %s461_s5, [#allocation3]  }
 0x1a6   :  { %348 = dma.done.wait [#allocation3], 128  }
 0x1a7   :  { %349 = vsyncadd [#allocation3], 4294967168 }
 0x1a8   :  { %350 = dma.done.wait [#allocation5], 128  }
 0x1a9   :  { %351 = vsyncadd [#allocation5], 4294967168 }
 0x1aa   :  { %240 = vsyncpa [#allocation3], 1 }
 0x1ab   :  { %241 = vsyncpa [#allocation5], 1 }

</bundles_post_ra>
